<compile_context>
chip_gen: v6e
topology: v6e:2x2x1
jax: 0.10.0
libtpu: 0.0.40
codegen_flags: <defaults>
</compile_context>

<pallas_src>
import math

import jax
import jax.numpy as jnp
from jax.experimental import pallas as pl
from jax.experimental.pallas import tpu as pltpu

EPS = 1e-5             # nn.BatchNorm1d default eps
NUM_REDUCE_CORES = 2   # leading "parallel" axis for phase 1 (v7x has 2 TCs; no-op cost on 1-TC chips)


def _normalize_kernel(x_ref, scale_ref, shift_ref, o_ref):
    """Phase 2: y = x * scale + shift (normalization + affine folded into 2 vectors)."""
    x = x_ref[...].astype(jnp.float32)
    o_ref[...] = (x * scale_ref[...] + shift_ref[...]).astype(o_ref.dtype)


def _make_reduce_kernel(tiles_per_core, tile, rows_valid, needs_mask):
    """Phase 1: per-feature-column sum / sum-of-squares across row tiles.

    The (1, 1, Dp) output blocks keep the same block index for every inner grid
    step, so they stay resident in VMEM and act as f32 accumulators.  Rows past
    `rows_valid` (ragged last tile, or the duplicated clamped block when the
    tile count does not split evenly across cores) are zeroed before accumulating.
    """

    def kernel(x_ref, sum_ref, sumsq_ref):
        @pl.when(pl.program_id(1) == 0)
        def _init():
            sum_ref[...] = jnp.zeros_like(sum_ref)
            sumsq_ref[...] = jnp.zeros_like(sumsq_ref)

        x = x_ref[...].astype(jnp.float32)
        if needs_mask:
            blk = pl.program_id(0) * tiles_per_core + pl.program_id(1)
            row = jax.lax.broadcasted_iota(jnp.int32, x.shape, 0) + blk * tile
            x = jnp.where(row < rows_valid, x, 0.0)
        sum_ref[...] += jnp.sum(x, axis=0, keepdims=True).reshape(sum_ref.shape)
        sumsq_ref[...] += jnp.sum(x * x, axis=0, keepdims=True).reshape(sumsq_ref.shape)

    return kernel


def _vmem_limit_bytes():
    """Generation-aware scoped-VMEM limit (v5e/v6e: 64 MiB, v7x: 48 MiB)."""
    try:
        cap = pltpu.get_tpu_info().vmem_capacity_bytes
    except Exception:
        cap = 64 * 1024 * 1024
    return int(min(64 * 1024 * 1024, max(32 * 1024 * 1024, (cap * 3) // 4)))


def _row_tile(dp, bytes_per_elem, rows, budget_bytes):
    """Largest row tile (multiple of 8, or the full row dim) fitting the budget."""
    tile = budget_bytes // max(dp * bytes_per_elem, 1)
    tile = max(8, (tile // 8) * 8)
    if tile >= rows:
        return rows            # single block equal to the full (possibly <8) row dim
    return tile


def _block_spec(shape, index_map, n_buffers=None):
    """BlockSpec with optional N-deep pipelining; falls back gracefully."""
    if n_buffers is not None:
        try:
            return pl.BlockSpec(shape, index_map, pipeline_mode=pl.Buffered(n_buffers))
        except Exception:
            pass
    return pl.BlockSpec(shape, index_map)


def batch_norm_x(x, gamma, beta):
    """Forward of BatchNormX (training-mode nn.BatchNorm1d over the last dim)."""
    D = x.shape[-1]
    orig_shape = x.shape
    orig_dtype = x.dtype
    x2d = x.reshape((-1, D))
    N = x2d.shape[0]

    # Lane packing: pack k consecutive rows side by side so the last dim is a
    # multiple of 128 (lane-dense loads and, crucially, unmasked stores).
    k = 128 // math.gcd(D, 128)
    Dp = k * D
    n_k = ((N + k - 1) // k) * k
    if n_k != N:                          # at most k-1 zero rows; zeros don't affect the sums
        x2d = jnp.pad(x2d, ((0, n_k - N), (0, 0)))
    rows = n_k // k                       # packed rows
    xp = x2d.reshape((rows, Dp))

    itemsize = jnp.dtype(orig_dtype).itemsize
    vmem_limit = _vmem_limit_bytes()
    budget = vmem_limit // 2

    # ---- Phase 1: tiled, pipelined, core-split reduction over rows ----
    # Per packed-row-element budget: 3 pipeline buffers in source dtype + ~2 f32 temps.
    tile1 = _row_tile(Dp, 3 * itemsize + 8, rows, budget)
    num_tiles1 = pl.cdiv(rows, tile1)
    nc = NUM_REDUCE_CORES
    tiles_per_core = pl.cdiv(num_tiles1, nc)
    needs_mask = (nc * tiles_per_core * tile1) != rows
    n_buffers = 3 if tiles_per_core > 2 else None   # deeper pipeline only for long grids

    reduce_kernel = _make_reduce_kernel(tiles_per_core, tile1, rows, needs_mask)
    sums, sumsqs = pl.pallas_call(
        reduce_kernel,
        out_shape=(
            jax.ShapeDtypeStruct((nc, 1, Dp), jnp.float32),
            jax.ShapeDtypeStruct((nc, 1, Dp), jnp.float32),
        ),
        grid=(nc, tiles_per_core),
        in_specs=[_block_spec(
            (tile1, Dp),
            # Clamp so duplicated trailing steps (tile count not divisible by the
            # core count) read a valid block; their rows are masked to zero.
            lambda c, i: (jnp.minimum(c * tiles_per_core + i, num_tiles1 - 1), 0),
            n_buffers=n_buffers)],
        out_specs=(
            pl.BlockSpec((1, 1, Dp), lambda c, i: (c, 0, 0)),
            pl.BlockSpec((1, 1, Dp), lambda c, i: (c, 0, 0)),
        ),
        compiler_params=pltpu.CompilerParams(
            dimension_semantics=("parallel", "arbitrary"),
            vmem_limit_bytes=vmem_limit,
        ),
    )(xp)

    # ---- O(D) parameter folding (outside the hot loops) ----
    n = jnp.float32(N)
    sum_f = sums.reshape((nc * k, D)).sum(axis=0)      # combine core + lane-group partials
    sumsq_f = sumsqs.reshape((nc * k, D)).sum(axis=0)
    mean = sum_f / n
    var = jnp.maximum(sumsq_f / n - mean * mean, 0.0)  # biased variance (training mode)
    # TODO(synk): E[x^2]-E[x]^2 in f32 loses precision when |mean| >> std; use
    # shifted/centered sums if bit-tight parity with PyTorch is required.
    inv_std = jax.lax.rsqrt(var + EPS)
    scale = gamma.astype(jnp.float32) * inv_std
    shift = beta.astype(jnp.float32) - mean * scale
    scale_p = jnp.tile(scale, k).reshape((1, Dp))      # replicate per lane group
    shift_p = jnp.tile(shift, k).reshape((1, Dp))

    # ---- Phase 2: tiled, pipelined, lane-dense normalization ----
    # Per packed-row-element budget: double-buffered input + output + one f32 temp.
    tile2 = _row_tile(Dp, 2 * itemsize + 2 * itemsize + 4, rows, budget)
    num_tiles2 = pl.cdiv(rows, tile2)
    outp = pl.pallas_call(
        _normalize_kernel,
        out_shape=jax.ShapeDtypeStruct((rows, Dp), orig_dtype),
        grid=(num_tiles2,),
        in_specs=[
            pl.BlockSpec((tile2, Dp), lambda i: (i, 0)),
            pl.BlockSpec((1, Dp), lambda i: (0, 0)),   # constant blocks: stay resident
            pl.BlockSpec((1, Dp), lambda i: (0, 0)),
        ],
        out_specs=pl.BlockSpec((tile2, Dp), lambda i: (i, 0)),
        compiler_params=pltpu.CompilerParams(
            dimension_semantics=("parallel",),         # shard row tiles across TCs (v7x)
            vmem_limit_bytes=vmem_limit,
        ),
    )(xp, scale_p, shift_p)

    out = outp.reshape((n_k, D))
    if n_k != N:
        out = out[:N]
    # TODO(synk): PyTorch BatchNorm1d also updates running_mean/running_var during
    # training; that side-effect state is not part of forward()'s return value.
    # TODO(synk): for latency-critical tiny inputs the O(D) fold and the second
    # launch could be fused into one pallas_call; kept separate for clarity.
    return out.reshape(orig_shape)


def _reference(x, gamma, beta):
    D = x.shape[-1]
    x2d = x.reshape((-1, D)).astype(jnp.float32)
    mean = jnp.mean(x2d, axis=0, keepdims=True)
    var = jnp.mean((x2d - mean) ** 2, axis=0, keepdims=True)
    y = (x2d - mean) / jnp.sqrt(var + EPS) * gamma + beta
    return y.reshape(x.shape).astype(x.dtype)


if __name__ == "__main__":
    key = jax.random.PRNGKey(0)
    batch, seq, batch_dim = 2, 8, 32           # x: (2, 8, 32), BatchNorm1d(32)
    kx, kg, kb = jax.random.split(key, 3)
    x = jax.random.normal(kx, (batch, seq, batch_dim), dtype=jnp.float32)

    # nn.BatchNorm1d default init: weight = 1, bias = 0 (deterministic).
    gamma = jnp.ones((batch_dim,), dtype=jnp.float32)
    beta = jnp.zeros((batch_dim,), dtype=jnp.float32)

    out = jax.block_until_ready(batch_norm_x(x, gamma, beta))
    ref = _reference(x, gamma, beta)
    assert out.shape == x.shape and out.dtype == x.dtype
    assert jnp.allclose(out, ref, atol=1e-4, rtol=1e-4), float(jnp.max(jnp.abs(out - ref)))

    # Non-trivial affine + a row count that is not a multiple of the lane-packing
    # factor (N = 2*7 = 14), exercising the tiny pad/slice path and tail masking.
    gamma2 = jax.random.normal(kg, (batch_dim,), dtype=jnp.float32)
    beta2 = jax.random.normal(kb, (batch_dim,), dtype=jnp.float32)
    x2 = jax.random.normal(kb, (2, 7, batch_dim), dtype=jnp.float32)
    out2 = jax.block_until_ready(batch_norm_x(x2, gamma2, beta2))
    ref2 = _reference(x2, gamma2, beta2)
    assert jnp.allclose(out2, ref2, atol=1e-4, rtol=1e-4), float(jnp.max(jnp.abs(out2 - ref2)))

    print("KERNEL_OK")
</pallas_src>

<mosaic_0001>
module attributes {stable_mosaic.version = 11 : i64} {
  func.func @kernel(%arg0: i32, %arg1: i32, %arg2: memref<4x128xf32, #tpu.memory_space<vmem>>, %arg3: memref<1x1x128xf32, #tpu.memory_space<vmem>>, %arg4: memref<1x1x128xf32, #tpu.memory_space<vmem>>) attributes {dimension_semantics = [#tpu.dimension_semantics<parallel>, #tpu.dimension_semantics<arbitrary>], iteration_bounds = array<i64: 2, 1>, scalar_prefetch = 0 : i64, scratch_operands = 0 : i64, tpu.core_type = #tpu.core_type<tc>, window_params = [{transform_indices = @transform_0, window_bounds = array<i64: 4, 128>}, {transform_indices = @transform_1, window_bounds = array<i64: 1, 1, 128>}, {transform_indices = @transform_2, window_bounds = array<i64: 1, 1, 128>}]} {
    %c0_i32 = arith.constant 0 : i32
    %0 = arith.cmpi eq, %arg1, %c0_i32 : i32
    %1 = arith.extui %0 : i1 to i32
    %c0_i32_0 = arith.constant 0 : i32
    %2 = arith.cmpi ne, %1, %c0_i32_0 : i32
    scf.if %2 {
      %cst_17 = arith.constant 0.000000e+00 : f32
      %27 = vector.broadcast %cst_17 : f32 to vector<1x1x128xf32>
      %c0_18 = arith.constant 0 : index
      %c0_19 = arith.constant 0 : index
      %c0_20 = arith.constant 0 : index
      %28 = vector.load %arg3[%c0_18, %c0_19, %c0_20] : memref<1x1x128xf32, #tpu.memory_space<vmem>>, vector<1x1x128xf32>
      tpu.vector_store %arg3[%c0_18, %c0_19, %c0_20], %27 {strides = array<i32>} : memref<1x1x128xf32, #tpu.memory_space<vmem>>, vector<1x1x128xf32>,
      %cst_21 = arith.constant 0.000000e+00 : f32
      %29 = vector.broadcast %cst_21 : f32 to vector<1x1x128xf32>
      %c0_22 = arith.constant 0 : index
      %c0_23 = arith.constant 0 : index
      %c0_24 = arith.constant 0 : index
      %30 = vector.load %arg4[%c0_22, %c0_23, %c0_24] : memref<1x1x128xf32, #tpu.memory_space<vmem>>, vector<1x1x128xf32>
      tpu.vector_store %arg4[%c0_22, %c0_23, %c0_24], %29 {strides = array<i32>} : memref<1x1x128xf32, #tpu.memory_space<vmem>>, vector<1x1x128xf32>,
    } else {
    }
    %c0 = arith.constant 0 : index
    %c0_1 = arith.constant 0 : index
    %3 = vector.load %arg2[%c0, %c0_1] : memref<4x128xf32, #tpu.memory_space<vmem>>, vector<4x128xf32>
    %c1_i32 = arith.constant 1 : i32
    %4 = arith.muli %arg0, %c1_i32 : i32
    %5 = arith.addi %4, %arg1 : i32
    %6 = tpu.iota {dimensions = array<i32: 0>} : vector<4x128xi32>
    %c4_i32 = arith.constant 4 : i32
    %7 = arith.muli %5, %c4_i32 : i32
    %8 = vector.broadcast %7 : i32 to vector<4x128xi32>
    %9 = arith.addi %6, %8 : vector<4x128xi32>
    %c4_i32_2 = arith.constant 4 : i32
    %10 = vector.broadcast %c4_i32_2 : i32 to vector<4x128xi32>
    %11 = arith.cmpi slt, %9, %10 : vector<4x128xi32>
    %cst = arith.constant 0.000000e+00 : f32
    %12 = vector.broadcast %cst : f32 to vector<4x128xf32>
    %13 = arith.select %11, %3, %12 : vector<4x128xi1>, vector<4x128xf32>
    %c0_3 = arith.constant 0 : index
    %c0_4 = arith.constant 0 : index
    %c0_5 = arith.constant 0 : index
    %14 = vector.load %arg3[%c0_3, %c0_4, %c0_5] : memref<1x1x128xf32, #tpu.memory_space<vmem>>, vector<1x1x128xf32>
    %cst_6 = arith.constant dense<0.000000e+00> : vector<128xf32>
    %15 = vector.multi_reduction <add>, %13, %cst_6 [0] : vector<4x128xf32> to vector<128xf32>
    %16 = vector.shape_cast %15 : vector<128xf32> to vector<1x128xf32>
    %17 = vector.shape_cast %16 : vector<1x128xf32> to vector<1x1x128xf32>
    %18 = arith.addf %14, %17 : vector<1x1x128xf32>
    %c0_7 = arith.constant 0 : index
    %c0_8 = arith.constant 0 : index
    %c0_9 = arith.constant 0 : index
    %19 = vector.load %arg3[%c0_7, %c0_8, %c0_9] : memref<1x1x128xf32, #tpu.memory_space<vmem>>, vector<1x1x128xf32>
    tpu.vector_store %arg3[%c0_7, %c0_8, %c0_9], %18 {strides = array<i32>} : memref<1x1x128xf32, #tpu.memory_space<vmem>>, vector<1x1x128xf32>,
    %c0_10 = arith.constant 0 : index
    %c0_11 = arith.constant 0 : index
    %c0_12 = arith.constant 0 : index
    %20 = vector.load %arg4[%c0_10, %c0_11, %c0_12] : memref<1x1x128xf32, #tpu.memory_space<vmem>>, vector<1x1x128xf32>
    %21 = arith.mulf %13, %13 : vector<4x128xf32>
    %cst_13 = arith.constant dense<0.000000e+00> : vector<128xf32>
    %22 = vector.multi_reduction <add>, %21, %cst_13 [0] : vector<4x128xf32> to vector<128xf32>
    %23 = vector.shape_cast %22 : vector<128xf32> to vector<1x128xf32>
    %24 = vector.shape_cast %23 : vector<1x128xf32> to vector<1x1x128xf32>
    %25 = arith.addf %20, %24 : vector<1x1x128xf32>
    %c0_14 = arith.constant 0 : index
    %c0_15 = arith.constant 0 : index
    %c0_16 = arith.constant 0 : index
    %26 = vector.load %arg4[%c0_14, %c0_15, %c0_16] : memref<1x1x128xf32, #tpu.memory_space<vmem>>, vector<1x1x128xf32>
    tpu.vector_store %arg4[%c0_14, %c0_15, %c0_16], %25 {strides = array<i32>} : memref<1x1x128xf32, #tpu.memory_space<vmem>>, vector<1x1x128xf32>,
    return
  }
  func.func @transform_0(%arg0: i32, %arg1: i32) -> (i32, i32) {
    %c1_i32 = arith.constant 1 : i32
    %0 = arith.muli %arg0, %c1_i32 : i32
    %1 = arith.addi %0, %arg1 : i32
    %c0_i32 = arith.constant 0 : i32
    %2 = arith.minsi %1, %c0_i32 : i32
    %c0_i32_0 = arith.constant 0 : i32
    %c0_i32_1 = arith.constant 0 : i32
    return %2, %c0_i32_0 : i32, i32
  }
  func.func @transform_1(%arg0: i32, %arg1: i32) -> (i32, i32, i32) {
    %c0_i32 = arith.constant 0 : i32
    %c0_i32_0 = arith.constant 0 : i32
    %c0_i32_1 = arith.constant 0 : i32
    return %arg0, %c0_i32, %c0_i32_0 : i32, i32, i32
  }
  func.func @transform_2(%arg0: i32, %arg1: i32) -> (i32, i32, i32) {
    %c0_i32 = arith.constant 0 : i32
    %c0_i32_0 = arith.constant 0 : i32
    %c0_i32_1 = arith.constant 0 : i32
    return %arg0, %c0_i32, %c0_i32_0 : i32, i32, i32
  }
}

</mosaic_0001>

<bundles_post_ra>
// kernel: tpu_custom_call.1
= control target key start
LH: loop header
LB: loop body
LE: loop exit
PB: predicated region body
PF: predicated region fallthrough
CT: control target
= control target key end

     0   :  { %8 = vsyncpa [#allocation3], 0  ;;  %s853_s0 = inlined_call_operand.hbm [shape: f32[4,128], index: 0, kind: input, shape index: {}]   ;;  %s854_s1 = inlined_call_operand.hbm [shape: f32[2,1,128], index: 1, kind: output, shape index: {0}]   ;;  %s855_s2 = inlined_call_operand.hbm [shape: f32[2,1,128], index: 2, kind: output, shape index: {1}]  }
   0x1   :  { %10 = vsyncpa [#allocation3 + $0x1], 0 }
   0x2   :  { %11 = vsyncpa [#allocation4], 0 }
   0x3   :  { %13 = vsyncpa [#allocation4 + $0x1], 0 }
   0x4   :  { %14 = vsyncpa [#allocation7], 0 }
   0x5   :  { %16 = vsyncpa [#allocation7 + $0x1], 0  ;;  %s646_s9 = smov 0   ;;  %s648_s10 = smov 0  }
   0x6   :  { %s650_s11 = smov 0   ;;  %s652_s12 = smov 0  }
   0x7   :  { %s654_s13 = smov 0   ;;  %s656_s14 = smov 0  }
   0x8   :  { %s658_s15 = smov 0   ;;  %s660_s16 = smov 0  }
   0x9 LB: > { %s361_s17 = sadd.s32 4294967295, %s625_s16   ;;  %s362_s18 = sadd.s32 4294967294, %s625_s16   ;;  %s625_s16 = sphi %s660_s16, %s22_s16   ;;  %s621_s15 = sphi %s658_s15, %s874_s15   ;;  %s617_s14 = sphi %s656_s14, %s873_s14   ;;  %s613_s13 = sphi %s654_s13, %s843_s13   ;;  %s609_s12 = sphi %s652_s12, %s872_s12   ;;  %s605_s11 = sphi %s650_s11, %s871_s11   ;;  %s601_s10 = sphi %s648_s10, %s870_s10   ;;  %s597_s9 = sphi %s646_s9, %s869_s9  }
   0xa   : > { %s34_s19 = sadd.s32 1, %s621_s15  ;;  %p594_p1 = scmp.ne.s32.totalorder %s613_s13, 0 }
   0xb   : > { %p36_p0 = scmp.ge.s32.totalorder %s34_s19, 2  ;;  %p55_p2 = scmp.eq.s32.totalorder %s625_s16, 0 }
   0xc   : > { %p60_p3 = scmp.ne.s32.totalorder %s613_s13, %s609_s12  ;;  %p61_p5 = scmp.eq.s32.totalorder %s361_s17, 0 }
   0xd   : > { %s876_s19 = smov (%p36_p0, %s34_s19), 0  ;;  %p692_p4 = por %p594_p1, %p55_p2 }
   0xe   : > { %p696_p6 = por %p61_p5, %p60_p3  ;;  %s70_s22 = ssub.s32 %s621_s15, %s876_s19 }
   0xf   : > { %p71_p7 = scmp.eq.s32.totalorder %s70_s22, 0  ;;  %s73_s23 = sadd.s32 1, %s605_s11 }
  0x10   : > { %s859_s21 = scalar_select %p696_p6, 1, 0 }
  0x11   : > { %s704_s24 = scalar_select %p71_p7, %s605_s11, %s73_s23  }
  0x12   : > { %p83_p8 = scmp.ne.s32.totalorder %s605_s11, %s601_s10  ;;  %p84_p9 = scmp.eq.s32.totalorder %s361_s17, 1 }
  0x13   : > { %p89_p10 = scmp.ne.s32.totalorder %s601_s10, %s597_s9  ;;  %p90_p11 = scmp.eq.s32.totalorder %s362_s18, 1 }
  0x14   : > { %p710_p12 = por %p84_p9, %p83_p8  ;;  %p391_p1 = scmp.lt.s32.totalorder %s625_s16, 2 }
  0x15   : > { %p715_p0 = por %p90_p11, %p89_p10  ;;  %s627_s27 = smov [#allocation2]  }
  0x16   : > { %s860_s25 = scalar_select %p710_p12, 1, 0 }
  0x17   : > { %s861_s26 = scalar_select %p715_p0, 1, 0 }
  0x18   : > { %s150_s28 = sshll.u32 %s627_s27, 4  ;;  %p722_p2 = pnand %p391_p1, %p692_p4  ;;  %s151_s28 = int_to_ptr.vmem [resolvable:$true] %s150_s28 }
  0x19   : > { %s466_s4 = scalar_lea.hbm %s853_s0, 64 }
  0x1a   : > { %p467_p7 = scmp.ne.s32.totalorder %s853_s0, %s466_s4  ;;  %p468_p8 = pneg %p722_p2 }
  0x1b   : > { %p473_p4 = scmp.lt.s32.totalorder %s466_s4, %s466_s4 }
  0x1c   : > { %p469_p9 = pnand %p468_p8, %p467_p7 }
  0x1e   : > { %p470_p10 = pneg %p469_p9 }
  0x20   : > { %p475_p11 = pnand %p473_p4, %p470_p10 }
  0x22   : > { %478 = shalt.err (!%p475_p11)
}
  0x23   : > { %s479_s7 = scalar_lea.vmem %s151_s28, 64  ;;  %s486_s8 = scalar_lea.vmem %s151_s28, 128 }
  0x24   : > { %p480_p1 = scmp.ne.s32.totalorder %s151_s28, %s479_s7  ;;  %p487_p5 = scmp.lt.s32.totalorder %s151_s28, %s151_s28 }
  0x25   : > { %p488_p0 = scmp.lt.s32.totalorder %s486_s8, %s479_s7 }
  0x26   : > { %p482_p13 = pnand %p480_p1, %p468_p8 }
  0x27   : > { %p489_p12 = por %p488_p0, %p487_p5 }
  0x28   : > { %p483_p3 = pneg %p482_p13 }
  0x2a   : > { %p490_p6 = pnand %p489_p12, %p483_p3 }
  0x2c   : > { %493 = shalt.err (!%p490_p6)
}
  0x2d   : > { %383 = dma.hbm_to_vmem [thread:$0]  (!%p722_p2), %s853_s0, 64, %s151_s28, [#allocation3]  }
  0x2e   : > { %p863_p7 = scmp.lt.s32.totalorder %s625_s16, 3  ;;  %p864_p9 = scmp.ge.s32.totalorder %s625_s16, 1 }
  0x30   : > { %p156_p10 = pnand %p864_p9, %p863_p7 }
  0x31   : > { %s161_s18 = sand.u32 (!%p156_p10), 1, %s613_s13   ;;  %p865_p12 = scmp.ne.s32.totalorder (!%p156_p10), %s859_s21, 0 }
  0x32   : > { %159 = sbr.rel (%p156_p10) target bundleno = 114 (0x72), region = 24  ;;  %s368_s20 = sshll.u32 (!%p156_p10), %s161_s18, 2 }
  0x33   : > { %s162_s22 = scalar_lea.sflag (!%p156_p10), [#allocation3], %s161_s18  ;;  %s165_s23 = scalar_lea.vmem (!%p156_p10), [#allocation2], %s368_s20 }
  0x37   : > { %583 = dma.done.wait (%p865_p12), %s162_s22, 64  }
  0x38   : > { %585 = vsyncadd (%p865_p12), %s162_s22, 4294967232  ;;  %s751_s27 = sand.u32 1, %s601_s10   ;;  %v200_v0 = vlaneseq  ;;  %s369_s28 = sshll.u32 %s617_s14, 2  ;;  %v628_v2 = vmov 0.0   ;;  %vm208_vm1 = vcmask 1043456  }
  0x39   : > { %v203_v1 = vstv %s369_s28  ;;  %s755_s29 = scalar_lea.vmem [#allocation5], %s751_s27  ;;  %s759_s30 = scalar_lea.vmem [#allocation6], %s751_s27  ;;  %v198_v5 = vld [vmem:[%s165_s23] sm:$0xf] }
  0x3a   : > { %196 = vst [vmem:[%s755_s29] sm:$0x1] %v628_v2  ;;  %197 = vst [vmem:[%s759_s30] sm:$0x1] %v628_v2  ;;  %v201_v3 = vshrl.u32 %v200_v0, 7  ;;  %s370_s21 = sshll.u32 %s617_s14, 4  ;;  %s246_s3 = sshll.u32 %s755_s29, 4  ;;  %s772_s3 = int_to_ptr.vmem [resolvable:$true] %s246_s3 }
  0x3b   : > { %s259_s4 = sshll.u32 %s759_s30, 4  ;;  %s770_s7 = scalar_lea.hbm %s854_s1, %s370_s21  ;;  %s780_s4 = int_to_ptr.vmem [resolvable:$true] %s259_s4 }
  0x3c   : > { %v204_v4 = vadd.s32 %v203_v1, %v201_v3  ;;  %s778_s12 = scalar_lea.hbm %s855_s2, %s370_s21  ;;  %s230_s17 = scalar_lea.sflag [#allocation4], %s751_s27 }
  0x3d   : > { %s494_s18 = scalar_lea.vmem %s772_s3, 16  ;;  %p866_p13 = scmp.ne.s32.totalorder %s860_s25, 0 }
  0x3e   : > { %vm205_vm0 = vcmp.lt.s32.totalorder %v204_v4, 4  ;;  %p495_p6 = scmp.ne.s32.totalorder %s772_s3, %s494_s18  ;;  %s629_s20 = smov [#allocation5]  }
  0x3f   : > { %v206_v6 = vsel %vm205_vm0, %v198_v5, 0.0  ;;  %s498_s22 = sshll.u32 %s629_s20, 4  ;;  %s499_s22 = int_to_ptr.vmem [resolvable:$false] %s498_s22 }
  0x40   : > { %v209_v7 = vsel %vm208_vm1, %v206_v6, 0.0  ;;  %v219_v8 = vmul.f32 %v206_v6, %v206_v6  ;;  %p496_p0 = pnand %p495_p6, %p866_p13  ;;  %s500_s23 = scalar_lea.vmem %s499_s22, 32 }
  0x41   : > { %v210_v9 = vrot.slane %v209_v7, 4  ;;  %v207_v19 = vld [vmem:[%s755_s29] sm:$0x1]  ;;  %p501_p3 = scmp.lt.s32.totalorder %s772_s3, %s499_s22  ;;  %p502_p5 = scmp.lt.s32.totalorder %s500_s23, %s494_s18 }
  0x42   : > { %v220_v10 = vsel %vm208_vm1, %v219_v8, 0.0  ;;  %v218_v22 = vld [vmem:[%s759_s30] sm:$0x1]  ;;  %p497_p2 = pneg %p496_p0 }
  0x43   : > { %v211_v11 = vadd.f32 %v210_v9, %v209_v7  ;;  %v221_v12 = vrot.slane %v220_v10, 4  ;;  %p503_p8 = por %p502_p5, %p501_p3 }
  0x45   : > { %v212_v13 = vrot.slane %v211_v11, 2  ;;  %v222_v14 = vadd.f32 %v221_v12, %v220_v10  ;;  %p504_p4 = pnand %p503_p8, %p497_p2 }
  0x47   : > { %v213_v15 = vadd.f32 %v212_v13, %v211_v11  ;;  %v223_v16 = vrot.slane %v222_v14, 2 }
  0x49   : > { %v214_v17 = vrot.slane %v213_v15, 1  ;;  %v224_v18 = vadd.f32 %v223_v16, %v222_v14 }
  0x4b   : > { %v215_v20 = vadd.f32 %v214_v17, %v213_v15  ;;  %v225_v21 = vrot.slane %v224_v18, 1 }
  0x4d   : > { %v216_v23 = vadd.f32 %v215_v20, %v207_v19  ;;  %v226_v24 = vadd.f32 %v225_v21, %v224_v18 }
  0x4f   : > { %217 = vst [vmem:[%s755_s29] sm:$0x1] %v216_v23  ;;  %v227_v25 = vadd.f32 %v226_v24, %v218_v22 }
  0x50   : > { %507 = shalt.err (!%p504_p4)
}
  0x51   : > { %s508_s28 = scalar_lea.hbm %s770_s7, 16  ;;  %s512_s5 = scalar_lea.hbm %s854_s1, 32 }
  0x52   : > { %p509_p11 = scmp.ne.s32.totalorder %s770_s7, %s508_s28  ;;  %p513_p9 = scmp.lt.s32.totalorder %s770_s7, %s854_s1 }
  0x53   : > { %p514_p10 = scmp.lt.s32.totalorder %s512_s5, %s508_s28 }
  0x54   : > { %p510_p1 = pnand %p509_p11, %p866_p13 }
  0x55   : > { %p515_p12 = por %p514_p10, %p513_p9 }
  0x56   : > { %p511_p7 = pneg %p510_p1 }
  0x58   : > { %p516_p6 = pnand %p515_p12, %p511_p7 }
  0x5a   : > { %519 = shalt.err (!%p516_p6)
}
  0x5b   : > { %376 = dma.vmem_to_hbm [thread:$0]  (%p866_p13), %s772_s3, 16, %s770_s7, %s230_s17   ;;  %228 = vst [vmem:[%s759_s30] sm:$0x1] %v227_v25 }
  0x5c   : > { %s234_s8 = scalar_lea.sflag [#allocation7], %s751_s27  ;;  %s520_s18 = scalar_lea.vmem %s780_s4, 16 }
  0x5d   : > { %p521_p0 = scmp.ne.s32.totalorder %s780_s4, %s520_s18  ;;  %s630_s20 = smov [#allocation6]  }
  0x5e   : > { %s524_s22 = sshll.u32 %s630_s20, 4  ;;  %s525_s22 = int_to_ptr.vmem [resolvable:$false] %s524_s22 }
  0x5f   : > { %p522_p2 = pnand %p521_p0, %p866_p13  ;;  %s526_s23 = scalar_lea.vmem %s525_s22, 32 }
  0x60   : > { %p527_p5 = scmp.lt.s32.totalorder %s780_s4, %s525_s22  ;;  %p528_p8 = scmp.lt.s32.totalorder %s526_s23, %s520_s18 }
  0x61   : > { %p523_p3 = pneg %p522_p2 }
  0x62   : > { %p529_p4 = por %p528_p8, %p527_p5 }
  0x64   : > { %p530_p11 = pnand %p529_p4, %p523_p3 }
  0x66   : > { %533 = shalt.err (!%p530_p11)
}
  0x67   : > { %s534_s30 = scalar_lea.hbm %s778_s12, 16  ;;  %s538_s7 = scalar_lea.hbm %s855_s2, 32 }
  0x68   : > { %p535_p1 = scmp.ne.s32.totalorder %s778_s12, %s534_s30  ;;  %p539_p10 = scmp.lt.s32.totalorder %s778_s12, %s855_s2 }
  0x69   : > { %p540_p12 = scmp.lt.s32.totalorder %s538_s7, %s534_s30 }
  0x6a   : > { %p536_p7 = pnand %p535_p1, %p866_p13 }
  0x6b   : > { %p541_p6 = por %p540_p12, %p539_p10 }
  0x6c   : > { %p537_p9 = pneg %p536_p7 }
  0x6e   : > { %p542_p0 = pnand %p541_p6, %p537_p9 }
  0x70   : > { %545 = shalt.err (!%p542_p0)
}
  0x71   : > { %377 = dma.vmem_to_hbm [thread:$0]  (%p866_p13), %s780_s4, 16, %s778_s12, %s234_s8  }
  0x72 PF: > { %s271_s29 = sand.u32 1, %s597_s9   ;;  %p867_p2 = scmp.ne.s32.totalorder %s861_s26, 0 }
  0x73   : > { %p868_p3 = scmp.ge.s32.totalorder %s625_s16, 2  ;;  %s272_s21 = scalar_lea.sflag [#allocation4], %s271_s29 }
  0x75   : > { %p385_p5 = pnand %p868_p3, %p867_p2 }
  0x77   : > { %p386_p8 = pneg %p385_p5 }
  0x79   : > { %587 = dma.done.wait (%p386_p8), %s272_s21, 16  }
  0x7a   : > { %589 = vsyncadd (%p386_p8), %s272_s21, 4294967280  ;;  %s280_s5 = scalar_lea.sflag [#allocation7], %s271_s29 }
  0x7b   : > { %591 = dma.done.wait (%p386_p8), %s280_s5, 16  }
  0x7c   : > { %593 = vsyncadd (%p386_p8), %s280_s5, 4294967280  ;;  %s22_s16 = sadd.s32 1, %s625_s16   ;;  %s869_s9 = smov %s601_s10 }
  0x7d   : > { %p19_p4 = scmp.ge.s32.totalorder %s22_s16, 4   ;;  %s870_s10 = smov %s605_s11 }
  0x7e   : > { %s871_s11 = smov %s704_s24  ;;  %s872_s12 = smov %s613_s13 }
  0x7f   : > { %s843_s13 = smov 0   ;;  %s873_s14 = smov %s621_s15 }
  0x80   : > { %s874_s15 = smov %s876_s19  ;;  %21 = sbr.rel (!%p19_p4) target bundleno = 9 (0x9), region = 90 }
  0x85   :  { %284 = vsyncpa [#allocation3], 1 }
  0x86   :  { %286 = vsyncpa [#allocation3 + $0x1], 1 }
  0x87   :  { %287 = vsyncpa [#allocation4], 1 }
  0x88   :  { %289 = vsyncpa [#allocation4 + $0x1], 1 }
  0x89   :  { %290 = vsyncpa [#allocation7], 1 }
  0x8a   :  { %292 = vsyncpa [#allocation7 + $0x1], 1 }

</bundles_post_ra>
